<compile_context>
chip_gen: v7x
topology: tpu7x:2x2x1
jax: 0.10.0
libtpu: 0.0.40
codegen_flags: <defaults>
</compile_context>

<pallas_src>
import jax
import jax.numpy as jnp
from jax.experimental import pallas as pl
from jax.experimental.pallas import tpu as pltpu


def _argmax_rows(x, handle_nan):
    """First-occurrence argmax along axis 1 of a (b, C) tile -> (b, 1) int32.

    Matches torch.argmax tie-breaking (first maximal index). NaNs are mapped
    to +inf so a NaN row still behaves as "maximal" like torch; rows mixing
    +inf and NaN may tie-break differently from torch (documented edge case).
    """
    b, c = x.shape
    if handle_nan and jnp.issubdtype(x.dtype, jnp.floating):
        x = jnp.where(jnp.isnan(x), jnp.array(jnp.inf, x.dtype), x)
    col = jax.lax.broadcasted_iota(jnp.int32, (b, c), 1)
    row_max = jnp.max(x, axis=1, keepdims=True)
    # Sentinel C for non-max positions -> min picks the first maximal index.
    masked = jnp.where(x == row_max, col, jnp.int32(c))
    return jnp.min(masked, axis=1, keepdims=True)  # (b, 1) int32


def _make_kernel(batch, tile_b, handle_nan):
    def kernel(in_ref, tgt_ref, out_ref):
        pred = _argmax_rows(in_ref[...], handle_nan)    # (tile_b, 1) int32
        truth = _argmax_rows(tgt_ref[...], handle_nan)  # (tile_b, 1) int32
        # Ragged tail handled in-kernel: rows >= batch (garbage in the padded
        # final block) never count, so no wrapper-side pad/concatenate pass.
        row = pl.program_id(0) * tile_b + jax.lax.broadcasted_iota(
            jnp.int32, (tile_b, 1), 0
        )
        match = (pred == truth) & (row < batch)
        out_ref[0, 0] = jnp.sum(match.astype(jnp.int32))

    return kernel


def squared_accuracy(inp, target, *, handle_nan=True, vmem_budget_bytes=20 << 20):
    """Pallas equivalent of SquaredAccuracy.forward. Returns a scalar f32."""
    assert inp.shape == target.shape and inp.ndim == 2
    B, C = inp.shape

    if C == 1:
        # argmax of a single column is always 0 -> every row matches.
        return jnp.float32(B)

    in_isz = jnp.dtype(inp.dtype).itemsize
    tgt_isz = jnp.dtype(target.dtype).itemsize

    # Sublane packing alignment: f32 -> 8 rows, bf16 -> 16, int8/fp8 -> 32.
    row_align = max(32 // min(in_isz, tgt_isz), 8)

    # --- Tile sizing (the main lever). VMEM footprint per row is accounted
    # with the lane-padded class width: 2 inputs x 2 pipeline buffers, plus
    # two int32 intermediates (column iota + masked indices) of the same
    # padded footprint. Budget stays well under the 32 MiB scoped limit
    # (and v7x's 64 MiB physical VMEM).
    c_pad = ((C + 127) // 128) * 128
    per_row_bytes = c_pad * (2 * (in_isz + tgt_isz) + 2 * 4)
    tile_b = max(vmem_budget_bytes // per_row_bytes, row_align)
    tile_b = (tile_b // row_align) * row_align

    b_ceil = -(-B // row_align) * row_align          # B rounded up to alignment
    tile_b = min(tile_b, b_ceil)

    # Prefer >= 2 grid steps when the batch allows it, so dimension_semantics
    # ("parallel",) actually occupies both TensorCores on megacore parts.
    if tile_b >= b_ceil and B > 2 * row_align:
        half = -(-((B + 1) // 2) // row_align) * row_align
        tile_b = max(half, row_align)

    num_tiles = pl.cdiv(B, tile_b)

    cost = pl.CostEstimate(
        flops=10 * B * C,
        transcendentals=0,
        bytes_accessed=B * C * (in_isz + tgt_isz) + num_tiles * 4,
    )

    partials = pl.pallas_call(
        _make_kernel(B, tile_b, handle_nan),
        out_shape=jax.ShapeDtypeStruct((1, num_tiles), jnp.int32),
        grid_spec=pltpu.PrefetchScalarGridSpec(
            num_scalar_prefetch=0,
            grid=(num_tiles,),
            in_specs=[
                pl.BlockSpec((tile_b, C), lambda i: (i, 0)),
                pl.BlockSpec((tile_b, C), lambda i: (i, 0)),
            ],
            out_specs=pl.BlockSpec(
                (1, 1), lambda i: (0, i), memory_space=pltpu.SMEM
            ),
        ),
        compiler_params=pltpu.CompilerParams(
            dimension_semantics=("parallel",),
            # v5e's scoped default is only 16 MiB; raise it explicitly while
            # the tile budget stays under v7x's 64 MiB physical VMEM.
            vmem_limit_bytes=32 << 20,
        ),
        cost_estimate=cost,
    )(inp, target)

    return jnp.sum(partials).astype(jnp.float32)


def _reference(inp, target):
    return jnp.sum(
        (jnp.argmax(inp, axis=1) == jnp.argmax(target, axis=1)).astype(jnp.float32)
    )


if __name__ == "__main__":
    key = jax.random.PRNGKey(0)
    k1, k2, k3, k4, k5, k6 = jax.random.split(key, 6)

    # Small, module-consistent shapes: (batch, num_classes) logits + one-hot targets.
    B, C = 16, 32
    logits = jax.random.normal(k1, (B, C), dtype=jnp.float32)
    labels = jax.random.randint(k2, (B,), 0, C)
    target = jax.nn.one_hot(labels, C, dtype=jnp.float32)

    result = squared_accuracy(logits, target)
    jax.block_until_ready(result)
    assert jnp.allclose(result, _reference(logits, target)), (
        result,
        _reference(logits, target),
    )

    # Ragged batch (exercises the in-kernel row mask).
    B2 = 13
    logits2 = jax.random.normal(k3, (B2, C), dtype=jnp.float32)
    labels2 = jax.random.randint(k4, (B2,), 0, C)
    target2 = jax.nn.one_hot(labels2, C, dtype=jnp.float32)
    result2 = squared_accuracy(logits2, target2)
    jax.block_until_ready(result2)
    assert jnp.allclose(result2, _reference(logits2, target2)), (
        result2,
        _reference(logits2, target2),
    )

    # bf16, multi-tile grid + ragged final tile (exercises megacore split,
    # sublane alignment of 16, and masking of the padded tail block).
    B3, C3 = 37, 20
    logits3 = jax.random.normal(k5, (B3, C3), dtype=jnp.bfloat16)
    labels3 = jax.random.randint(k6, (B3,), 0, C3)
    target3 = jax.nn.one_hot(labels3, C3, dtype=jnp.bfloat16)
    result3 = squared_accuracy(logits3, target3)
    jax.block_until_ready(result3)
    assert jnp.allclose(result3, _reference(logits3, target3)), (
        result3,
        _reference(logits3, target3),
    )

    print("KERNEL_OK")
</pallas_src>

<mosaic_0001>
module attributes {stable_mosaic.version = 11 : i64} {
  func.func @kernel(%arg0: i32, %arg1: memref<16x32xf32, #tpu.memory_space<vmem>>, %arg2: memref<16x32xf32, #tpu.memory_space<vmem>>, %arg3: memref<1x1xi32, #tpu.memory_space<smem>>) attributes {dimension_semantics = [#tpu.dimension_semantics<parallel>], iteration_bounds = array<i64: 1>, scalar_prefetch = 0 : i64, scratch_operands = 0 : i64, tpu.core_type = #tpu.core_type<tc>, window_params = [{transform_indices = @transform_0, window_bounds = array<i64: 16, 32>}, {transform_indices = @transform_1, window_bounds = array<i64: 16, 32>}, {transform_indices = @transform_2, window_bounds = array<i64: 1, 1>}]} {
    %c0 = arith.constant 0 : index
    %c0_0 = arith.constant 0 : index
    %0 = vector.load %arg1[%c0, %c0_0] : memref<16x32xf32, #tpu.memory_space<vmem>>, vector<16x32xf32>
    %1 = arith.cmpf one, %0, %0 : vector<16x32xf32>
    %cst = arith.constant 0x7F800000 : f32
    %2 = vector.broadcast %cst : f32 to vector<16x32xf32>
    %3 = arith.select %1, %2, %0 : vector<16x32xi1>, vector<16x32xf32>
    %4 = tpu.iota {dimensions = array<i32: 1>} : vector<16x32xi32>
    %cst_1 = arith.constant dense<0xFF800000> : vector<16xf32>
    %5 = vector.multi_reduction <maximumf>, %3, %cst_1 [1] : vector<16x32xf32> to vector<16xf32>
    %6 = vector.shape_cast %5 : vector<16xf32> to vector<16x1xf32>
    %7 = vector.broadcast %6 : vector<16x1xf32> to vector<16x32xf32>
    %8 = arith.cmpf oeq, %3, %7 : vector<16x32xf32>
    %c32_i32 = arith.constant 32 : i32
    %9 = vector.broadcast %c32_i32 : i32 to vector<16x32xi32>
    %10 = arith.select %8, %4, %9 : vector<16x32xi1>, vector<16x32xi32>
    %cst_2 = arith.constant dense<2147483647> : vector<16xi32>
    %11 = vector.multi_reduction <minsi>, %10, %cst_2 [1] : vector<16x32xi32> to vector<16xi32>
    %12 = vector.shape_cast %11 : vector<16xi32> to vector<16x1xi32>
    %c0_3 = arith.constant 0 : index
    %c0_4 = arith.constant 0 : index
    %13 = vector.load %arg2[%c0_3, %c0_4] : memref<16x32xf32, #tpu.memory_space<vmem>>, vector<16x32xf32>
    %14 = arith.cmpf one, %13, %13 : vector<16x32xf32>
    %cst_5 = arith.constant 0x7F800000 : f32
    %15 = vector.broadcast %cst_5 : f32 to vector<16x32xf32>
    %16 = arith.select %14, %15, %13 : vector<16x32xi1>, vector<16x32xf32>
    %17 = tpu.iota {dimensions = array<i32: 1>} : vector<16x32xi32>
    %cst_6 = arith.constant dense<0xFF800000> : vector<16xf32>
    %18 = vector.multi_reduction <maximumf>, %16, %cst_6 [1] : vector<16x32xf32> to vector<16xf32>
    %19 = vector.shape_cast %18 : vector<16xf32> to vector<16x1xf32>
    %20 = vector.broadcast %19 : vector<16x1xf32> to vector<16x32xf32>
    %21 = arith.cmpf oeq, %16, %20 : vector<16x32xf32>
    %c32_i32_7 = arith.constant 32 : i32
    %22 = vector.broadcast %c32_i32_7 : i32 to vector<16x32xi32>
    %23 = arith.select %21, %17, %22 : vector<16x32xi1>, vector<16x32xi32>
    %cst_8 = arith.constant dense<2147483647> : vector<16xi32>
    %24 = vector.multi_reduction <minsi>, %23, %cst_8 [1] : vector<16x32xi32> to vector<16xi32>
    %25 = vector.shape_cast %24 : vector<16xi32> to vector<16x1xi32>
    %c16_i32 = arith.constant 16 : i32
    %26 = arith.muli %arg0, %c16_i32 : i32
    %27 = tpu.iota {dimensions = array<i32: 0>} : vector<16x1xi32>
    %28 = vector.broadcast %26 : i32 to vector<16x1xi32>
    %29 = arith.addi %28, %27 : vector<16x1xi32>
    %30 = arith.cmpi eq, %12, %25 : vector<16x1xi32>
    %c16_i32_9 = arith.constant 16 : i32
    %31 = vector.broadcast %c16_i32_9 : i32 to vector<16x1xi32>
    %32 = arith.cmpi slt, %29, %31 : vector<16x1xi32>
    %33 = arith.andi %30, %32 : vector<16x1xi1>
    %34 = arith.extui %33 : vector<16x1xi1> to vector<16x1xi32>
    %35 = vector.shape_cast %34 : vector<16x1xi32> to vector<1x16x1xi32>
    %cst_10 = arith.constant dense<0> : vector<1xi32>
    %36 = vector.multi_reduction <add>, %35, %cst_10 [1, 2] : vector<1x16x1xi32> to vector<1xi32>
    %37 = vector.shape_cast %36 : vector<1xi32> to vector<1x1x1xi32>
    %38 = vector.extract %37[0, 0, 0] : i32 from vector<1x1x1xi32>
    %c0_11 = arith.constant 0 : index
    %c0_12 = arith.constant 0 : index
    %39 = memref.load %arg3[%c0_11, %c0_12] : memref<1x1xi32, #tpu.memory_space<smem>>
    memref.store %38, %arg3[%c0_11, %c0_12] : memref<1x1xi32, #tpu.memory_space<smem>>
    return
  }
  func.func @transform_0(%arg0: i32) -> (i32, i32) {
    %c0_i32 = arith.constant 0 : i32
    %c0_i32_0 = arith.constant 0 : i32
    return %arg0, %c0_i32 : i32, i32
  }
  func.func @transform_1(%arg0: i32) -> (i32, i32) {
    %c0_i32 = arith.constant 0 : i32
    %c0_i32_0 = arith.constant 0 : i32
    return %arg0, %c0_i32 : i32, i32
  }
  func.func @transform_2(%arg0: i32) -> (i32, i32) {
    %c0_i32 = arith.constant 0 : i32
    %c0_i32_0 = arith.constant 0 : i32
    return %c0_i32, %arg0 : i32, i32
  }
}

</mosaic_0001>

<bundles_post_ra>
// kernel: tpu_custom_call.1
= control target key start
LH: loop header
LB: loop body
LE: loop exit
PB: predicated region body
PF: predicated region fallthrough
CT: control target
= control target key end

     0   :  { %7 = vsyncpa [#allocation3], 0  ;;  %s308_s0 = inlined_call_operand.hbm [shape: f32[16,32], index: 0, kind: input, shape index: {}]   ;;  %s309_s1 = inlined_call_operand.hbm [shape: f32[16,32], index: 1, kind: input, shape index: {}]   ;;  %s310_s2 = inlined_call_operand.hbm [shape: s32[1,1], index: 2, kind: output, shape index: {}]  }
   0x1   :  { %8 = vsyncpa [#allocation6], 0 }
   0x2   :  { %9 = vsyncpa [#allocation4], 0  ;;  %s243_s9 = smov [#allocation2]   ;;  %s183_s13 = scalar_lea.hbm %s308_s0, 256 }
   0x3   :  { %s15_s10 = sshll.u32 %s243_s9, 4  ;;  %p184_p0 = scmp.ne.s32.totalorder %s308_s0, %s183_s13  ;;  %s16_s10 = int_to_ptr.vmem [resolvable:$true] %s15_s10 }
   0x4   :  { %p187_p1 = scmp.lt.u32.totalorder %s183_s13, %s308_s0 }
   0x6   :  { %p189_p2 = pnand %p187_p1, %p184_p0 }
   0x8   :  { %192 = shalt.err (!%p189_p2)
}
   0x9   :  { %s193_s18 = scalar_lea.vmem %s16_s10, 256  ;;  %p198_p4 = scmp.lt.s32.totalorder %s16_s10, %s16_s10 }
   0xa   :  { %p194_p3 = scmp.ne.s32.totalorder %s16_s10, %s193_s18  ;;  %p199_p5 = scmp.lt.s32.totalorder %s193_s18, %s193_s18 }
   0xc   :  { %p200_p6 = por %p199_p5, %p198_p4 }
   0xe   :  { %p201_p7 = pnand %p200_p6, %p194_p3 }
  0x10   :  { %204 = shalt.err (!%p201_p7)
}
  0x11   :  { %s244_s19 = smov 128   ;;  %s245_s20 = smov 8  }
  0x12   :  { %21 = dma.hbm_to_vmem [thread:$0]  %s308_s0, 256, %s16_s10, [#allocation3], %s244_s19, %s244_s19, %s245_s20  }
  0x13   :  { %s246_s23 = smov [#allocation5]   ;;  %s205_s27 = scalar_lea.hbm %s309_s1, 256 }
  0x14   :  { %s27_s24 = sshll.u32 %s246_s23, 4  ;;  %p206_p8 = scmp.ne.s32.totalorder %s309_s1, %s205_s27  ;;  %s28_s24 = int_to_ptr.vmem [resolvable:$true] %s27_s24 }
  0x15   :  { %p209_p9 = scmp.lt.u32.totalorder %s205_s27, %s309_s1 }
  0x17   :  { %p211_p10 = pnand %p209_p9, %p206_p8 }
  0x19   :  { %214 = shalt.err (!%p211_p10)
}
  0x1a   :  { %s215_s4 = scalar_lea.vmem %s28_s24, 256  ;;  %p220_p12 = scmp.lt.s32.totalorder %s28_s24, %s28_s24 }
  0x1b   :  { %p216_p11 = scmp.ne.s32.totalorder %s28_s24, %s215_s4  ;;  %p221_p13 = scmp.lt.s32.totalorder %s215_s4, %s215_s4 }
  0x1d   :  { %p222_p0 = por %p221_p13, %p220_p12 }
  0x1f   :  { %p223_p1 = pnand %p222_p0, %p216_p11 }
  0x21   :  { %226 = shalt.err (!%p223_p1)
}
  0x22   :  { %33 = dma.hbm_to_vmem [thread:$0]  %s309_s1, 256, %s28_s24, [#allocation6], %s244_s19, %s244_s19, %s245_s20  }
  0x23   :  { %237 = dma.done.wait [#allocation3], 256  }
  0x24   :  { %238 = vsyncadd [#allocation3], 4294967040 }
  0x25   :  { %239 = dma.done.wait [#allocation6], 256  }
  0x26   :  { %240 = vsyncadd [#allocation6], 4294967040  ;;  %v40_v0 = vld [vmem:[#allocation2] sm:$0xff]  ;;  %vm48_vm0 = vcmask 261120   ;;  %v89_v1 = vld [vmem:[#allocation5] sm:$0xff]  ;;  %v46_v12 = vlaneseq  ;;  %s227_s8 = scalar_lea.hbm %s310_s2, 16 }
  0x27   :  { %v41_v2 = vld [vmem:[#allocation2 + $0x8] sm:$0xff]  ;;  %vm42_vm1 = vcmp.ne.f32.partialorder %v40_v0, %v40_v0  ;;  %vm91_vm2 = vcmp.ne.f32.partialorder %v89_v1, %v89_v1  ;;  %v90_v3 = vld [vmem:[#allocation5 + $0x8] sm:$0xff]  ;;  %p228_p2 = scmp.ne.s32.totalorder %s310_s2, %s227_s8  ;;  %p231_p3 = scmp.lt.u32.totalorder %s227_s8, %s310_s2 }
  0x28   :  { %vm43_vm3 = vcmp.ne.f32.partialorder %v41_v2, %v41_v2  ;;  %v44_v4 = vsel %vm42_vm1, inf, %v40_v0  ;;  %v93_v5 = vsel %vm91_vm2, inf, %v89_v1  ;;  %vm92_vm4 = vcmp.ne.f32.partialorder %v90_v3, %v90_v3 }
  0x29   :  { %v45_v6 = vsel %vm43_vm3, inf, %v41_v2  ;;  %v49_v7 = vsel %vm48_vm0, %v44_v4, -inf  ;;  %v95_v8 = vsel %vm48_vm0, %v93_v5, -inf  ;;  %v94_v9 = vsel %vm92_vm4, inf, %v90_v3  ;;  %p233_p4 = pnand %p231_p3, %p228_p2 }
  0x2a   :  { %50 = vmax.xlane.f32.xlu0 %v49_v7  ;;  %96 = vmax.xlane.f32.xlu1 %v95_v8  ;;  %v52_v10 = vsel %vm48_vm0, %v45_v6, -inf  ;;  %v98_v11 = vsel %vm48_vm0, %v94_v9, -inf  ;;  %v47_v13 = vand.u32 127, %v46_v12 }
  0x2e   :  { %53 = vmax.xlane.f32.xlu0 %v52_v10  ;;  %99 = vmax.xlane.f32.xlu1 %v98_v11 }
  0xb7   :  { %v51_v14 = vpop.xlane.xlu0 %50  ;;  %v97_v15 = vpop.xlane.xlu1 %96 }
  0xb8   :  { %vm55_vm5 = vcmp.eq.f32.partialorder %v44_v4, %v51_v14  ;;  %vm101_vm6 = vcmp.eq.f32.partialorder %v93_v5, %v97_v15 }
  0xb9   :  { %v57_v16 = vsel %vm55_vm5, %v47_v13, 32  ;;  %v103_v17 = vsel %vm101_vm6, %v47_v13, 32 }
  0xba   :  { %v59_v18 = vsel %vm48_vm0, %v57_v16, 2147483647  ;;  %v105_v19 = vsel %vm48_vm0, %v103_v17, 2147483647 }
  0xbb   :  { %v54_v20 = vpop.xlane.xlu0 %53  ;;  %v100_v21 = vpop.xlane.xlu1 %99  ;;  %v61_v22 = vshra.s32 %v59_v18, 16  ;;  %v107_v23 = vshra.s32 %v105_v19, 16  ;;  %v60_v34 = vand.u32 65535, %v59_v18  ;;  %v106_v38 = vand.u32 65535, %v105_v19 }
  0xbc   :  { %vm56_vm7 = vcmp.eq.f32.partialorder %v45_v6, %v54_v20  ;;  %vm102_vm8 = vcmp.eq.f32.partialorder %v94_v9, %v100_v21  ;;  %v247_v6 = vmov 0  }
  0xbd   :  { %v58_v24 = vsel %vm56_vm7, %v47_v13, 32  ;;  %v104_v25 = vsel %vm102_vm8, %v47_v13, 32  ;;  %v63_v26 = vcvt.s32.f32 %v61_v22  ;;  %v109_v29 = vcvt.s32.f32 %v107_v23 }
  0xbe   :  { %v74_v27 = vsel %vm48_vm0, %v58_v24, 2147483647  ;;  %v120_v28 = vsel %vm48_vm0, %v104_v25, 2147483647  ;;  %v62_v36 = vcvt.s32.f32 %v60_v34  ;;  %v108_v43 = vcvt.s32.f32 %v106_v38 }
  0xbf   :  { %64 = vmin.xlane.f32.xlu0 %v63_v26  ;;  %v76_v30 = vshra.s32 %v74_v27, 16  ;;  %v122_v31 = vshra.s32 %v120_v28, 16  ;;  %v75_v37 = vand.u32 65535, %v74_v27  ;;  %v121_v44 = vand.u32 65535, %v120_v28 }
  0xc1   :  { %v78_v32 = vcvt.s32.f32 %v76_v30  ;;  %v124_v33 = vcvt.s32.f32 %v122_v31  ;;  %v77_v42 = vcvt.s32.f32 %v75_v37  ;;  %v123_v48 = vcvt.s32.f32 %v121_v44 }
  0xc3   :  { %110 = vmin.xlane.f32.xlu0 %v109_v29  ;;  %79 = vmin.xlane.f32.xlu1 %v78_v32 }
  0xc7   :  { %125 = vmin.xlane.f32.xlu1 %v124_v33 }
 0x14c   :  { %v65_v35 = vpop.xlane.xlu0 %64 }
 0x14d   :  { %vm66_vm9 = vcmp.eq.f32.partialorder %v63_v26, %v65_v35  ;;  %v71_v52 = vcvt.f32.s32 %v65_v35 }
 0x14e   :  { %v67_v39 = vsel %vm66_vm9, %v62_v36, inf }
 0x14f   :  { %68 = vmin.xlane.f32.xlu0 %v67_v39  ;;  %v72_v60 = vshll.u32 %v71_v52, 16 }
 0x150   :  { %v80_v40 = vpop.xlane.xlu1 %79  ;;  %v111_v41 = vpop.xlane.xlu0 %110 }
 0x151   :  { %vm81_vm10 = vcmp.eq.f32.partialorder %v78_v32, %v80_v40  ;;  %vm112_vm11 = vcmp.eq.f32.partialorder %v109_v29, %v111_v41  ;;  %v117_v51 = vcvt.f32.s32 %v111_v41  ;;  %v86_v53 = vcvt.f32.s32 %v80_v40 }
 0x152   :  { %v82_v45 = vsel %vm81_vm10, %v77_v42, inf  ;;  %v113_v46 = vsel %vm112_vm11, %v108_v43, inf }
 0x153   :  { %83 = vmin.xlane.f32.xlu1 %v82_v45  ;;  %114 = vmin.xlane.f32.xlu0 %v113_v46  ;;  %v118_v56 = vshll.u32 %v117_v51, 16  ;;  %v87_v0 = vshll.u32 %v86_v53, 16 }
 0x154   :  { %v126_v47 = vpop.xlane.xlu1 %125 }
 0x155   :  { %vm127_vm12 = vcmp.eq.f32.partialorder %v124_v33, %v126_v47  ;;  %v132_v57 = vcvt.f32.s32 %v126_v47 }
 0x156   :  { %v128_v49 = vsel %vm127_vm12, %v123_v48, inf }
 0x157   :  { %129 = vmin.xlane.f32.xlu1 %v128_v49  ;;  %v133_v1 = vshll.u32 %v132_v57, 16 }
 0x1dc   :  { %v69_v50 = vpop.xlane.xlu0 %68 }
 0x1dd   :  { %v70_v58 = vcvt.f32.s32 %v69_v50 }
 0x1df   :  { %v73_v2 = vadd.s32 %v72_v60, %v70_v58 }
 0x1e0   :  { %v84_v54 = vpop.xlane.xlu1 %83  ;;  %v115_v55 = vpop.xlane.xlu0 %114 }
 0x1e1   :  { %v116_v59 = vcvt.f32.s32 %v115_v55  ;;  %v85_v61 = vcvt.f32.s32 %v84_v54 }
 0x1e3   :  { %v119_v62 = vadd.s32 %v118_v56, %v116_v59  ;;  %v88_v4 = vadd.s32 %v87_v0, %v85_v61 }
 0x1e4   :  { %v130_v63 = vpop.xlane.xlu1 %129 }
 0x1e5   :  { %v131_v3 = vcvt.f32.s32 %v130_v63  ;;  %vm142_vm13 = vcmp.eq.s32.totalorder %v73_v2, %v119_v62 }
 0x1e6   :  { %v148_v7 = vsel %vm142_vm13, 1, %v247_v6 }
 0x1e7   :  { %v134_v5 = vadd.s32 %v133_v1, %v131_v3 }
 0x1e9   :  { %vm143_vm14 = vcmp.eq.s32.totalorder %v88_v4, %v134_v5 }
 0x1ea   :  { %v149_v8 = vsel %vm143_vm14, 1, %v247_v6 }
 0x1eb   :  { %v150_v9 = vadd.s32 %v149_v8, %v148_v7 }
 0x1ed   :  { %v151_v10 = vrot.slane %v150_v9, 4 }
 0x1ef   :  { %v152_v11 = vadd.s32 %v151_v10, %v150_v9 }
 0x1f1   :  { %v153_v12 = vrot.slane %v152_v11, 2 }
 0x1f3   :  { %v154_v13 = vadd.s32 %v153_v12, %v152_v11 }
 0x1f5   :  { %v155_v14 = vrot.slane %v154_v13, 1 }
 0x1f7   :  { %v156_v15 = vadd.s32 %v155_v14, %v154_v13 }
 0x1f9   :  { %175 = vpush %v156_v15 }
 0x22a   :  { %s176_s1 = spop %175 }
 0x22b   :  { %159 = sst [smem:[#allocation7]] %s176_s1 }
 0x22c   :  { %236 = shalt.err (!%p233_p4)
}
 0x22d   :  { %s248_s13 = smov [#allocation7]  }
 0x22e   :  { %167 = dma.smem_to_hbm %s248_s13, 16, %s310_s2, [#allocation4]  }
 0x22f   :  { %241 = dma.done.wait [#allocation4], 16  }
 0x230   :  { %242 = vsyncadd [#allocation4], 4294967280 }
 0x231   :  { %171 = sfence }
 0x232   :  { %172 = vsyncpa [#allocation3], 1 }
 0x233   :  { %173 = vsyncpa [#allocation6], 1 }
 0x234   :  { %174 = vsyncpa [#allocation4], 1 }

</bundles_post_ra>
